<compile_context>
chip_gen: v5e
topology: v5e:2x2
jax: 0.10.0
libtpu: 0.0.40
codegen_flags: <defaults>
</compile_context>

<pallas_src>
import jax
import jax.numpy as jnp
from jax.experimental import pallas as pl
from jax.experimental.pallas import tpu as pltpu

_EPS = 1e-5        # torch BatchNorm1d default eps
_OUT_PAD = 128     # lane-dense output width (multiple of 128)


def _softplus(x):
    # matches torch.nn.functional.softplus (beta=1, threshold=20)
    return jnp.where(x > 20.0, x, jnp.log1p(jnp.exp(jnp.minimum(x, 20.0))))


def _make_act(name):
    if name == "relu":
        return lambda x: jnp.maximum(x, 0.0)
    if name == "elu":
        return lambda x: jnp.where(x > 0.0, x, jnp.expm1(jnp.minimum(x, 0.0)))
    if name == "tanh":
        return jnp.tanh
    if name == "sigmoid":
        return lambda x: 1.0 / (1.0 + jnp.exp(-x))
    if name == "softplus":
        return _softplus
    raise ValueError("act not recognized")


def _make_mlp_kernel(depth, Y, act_name):
    """Fused FC-stack + output-head kernel body (depth is static -> the loop unrolls)."""
    act = _make_act(act_name)

    def kernel(x_ref, *rest):
        # rest = (w0', b0', w1, b1, ..., w_out_pad, b_out_pad, o_ref); weights bf16, biases f32.
        wb = rest[:-1]
        o_ref = rest[-1]

        # BatchNorm is folded into layer 0's weights, so the first matmul input is x directly.
        h = x_ref[...]                                                    # (TM, D) f32
        # TODO(synk): dropout with p > 0 would need pltpu.prng_seed / prng_random_bits;
        #             the module default p=0.0 (and eval mode) is the identity.
        for i in range(depth):
            w = wb[2 * i][...]                                            # bf16 (Ni, Ni+1)
            b = wb[2 * i + 1][...]                                        # f32  (1, Ni+1)
            h = jnp.dot(h.astype(jnp.bfloat16), w,
                        preferred_element_type=jnp.float32) + b
            h = act(h)                                                    # f32 elementwise

        w_o = wb[2 * depth][...]
        b_o = wb[2 * depth + 1][...]
        z = jnp.dot(h.astype(jnp.bfloat16), w_o,
                    preferred_element_type=jnp.float32) + b_o             # (TM, 128)

        # ---- output heads via lane-dense column masks (no slices / concatenation) ----
        # cols [0, Y)      : softplus
        # cols [Y, Y+2)    : softplus + 1
        # cols [Y+2, Y+4)  : identity
        # cols [Y+4, Y+5)  : tanh * 1e-4
        # cols [Y+5, ...)  : identity (includes the zero padding -> stays zero)
        col = jax.lax.broadcasted_iota(jnp.int32, z.shape, 1)
        sp = _softplus(z)
        th = jnp.tanh(z) * 1e-4
        out = jnp.where(col < Y, sp,
              jnp.where(col < Y + 2, sp + 1.0,
              jnp.where(col < Y + 4, z,
              jnp.where(col < Y + 5, th, z))))
        o_ref[...] = out.astype(o_ref.dtype)

    return kernel


def _round_up(x, m):
    return (x + m - 1) // m * m


def mlp_forward(x, params, *, shapeY, act="relu", tm=None):
    """x: (B, C, L) float32 with (C, L) == shapeX."""
    gamma, beta, fcs, (w_out, b_out) = params
    B, C, L = x.shape
    D = C * L
    depth = len(fcs)
    Dout = w_out.shape[1]
    assert depth >= 1 and Dout == shapeY + 11 and Dout <= _OUT_PAD

    x = x.astype(jnp.float32)

    # ---- BatchNorm1d training-mode batch stats (one cheap memory-bound pass in XLA);
    #      fold the per-flattened-column affine into layer 0: one-time O(D*N0) weight prep. ----
    mean = jnp.mean(x, axis=(0, 2))                                        # (C,)
    var = jnp.mean(jnp.square(x - mean[None, :, None]), axis=(0, 2))       # biased variance
    var = jnp.maximum(var, 0.0)                                            # cancellation guard
    scale_c = gamma.astype(jnp.float32) * jax.lax.rsqrt(var + _EPS)        # (C,)
    shift_c = beta.astype(jnp.float32) - mean * scale_c                    # (C,)
    scale_cols = jnp.repeat(scale_c, L)                                    # (D,)
    shift_cols = jnp.repeat(shift_c, L)                                    # (D,)

    w0, b0 = fcs[0]
    w0 = w0.astype(jnp.float32)
    w0p = scale_cols[:, None] * w0                                         # (D, N0)
    b0p = shift_cols @ w0 + b0.astype(jnp.float32)                         # (N0,)

    # Weights in bf16 (native MXU format), biases in f32 (added after the f32 accumulate).
    flat_wb = [w0p.astype(jnp.bfloat16), b0p.reshape(1, -1)]
    for w, b in fcs[1:]:
        flat_wb += [w.astype(jnp.bfloat16), b.reshape(1, -1).astype(jnp.float32)]

    # Pad the output projection lane dim to 128 for lane-dense (unmasked) stores.
    w_out_p = (jnp.zeros((w_out.shape[0], _OUT_PAD), jnp.float32)
               .at[:, :Dout].set(w_out.astype(jnp.float32)).astype(jnp.bfloat16))
    b_out_p = jnp.zeros((1, _OUT_PAD), jnp.float32).at[0, :Dout].set(b_out.astype(jnp.float32))
    flat_wb += [w_out_p, b_out_p]

    # ---- batch tiling ----
    if tm is None:
        tm = min(256, _round_up(B, 8))   # TM>=256 fills the MXU M dim on v6e/v7x for big B
    tm = max(8, _round_up(tm, 8))
    B_pad = _round_up(B, tm)
    x_flat = x.reshape(B, D)
    if B_pad != B:
        x_flat = jnp.pad(x_flat, ((0, B_pad - B), (0, 0)))

    grid = (B_pad // tm,)

    def _const_spec(a):
        # full-array block, constant index map -> fetched once, VMEM-resident across the grid
        return pl.BlockSpec(a.shape, lambda i: (0,) * a.ndim)

    in_specs = [pl.BlockSpec((tm, D), lambda i: (i, 0))] + [_const_spec(a) for a in flat_wb]
    out_specs = pl.BlockSpec((tm, _OUT_PAD), lambda i: (i, 0))

    kernel = _make_mlp_kernel(depth=depth, Y=int(shapeY), act_name=act)

    out = pl.pallas_call(
        kernel,
        out_shape=jax.ShapeDtypeStruct((B_pad, _OUT_PAD), jnp.float32),
        grid=grid,
        in_specs=in_specs,
        out_specs=out_specs,
        compiler_params=pltpu.CompilerParams(
            dimension_semantics=("parallel",),        # shard batch tiles across v7x's 2 TCs
            vmem_limit_bytes=48 * 1024 * 1024,        # > v5e/v6e scoped default, < v7x physical
        ),
    )(x_flat, *flat_wb)

    return out[:B, :Dout]


# ------------------------- pure-JAX reference (for checking) -------------------------
def _ref_mlp(x, params, shapeY, act="relu"):
    gamma, beta, fcs, (w_out, b_out) = params
    B, C, L = x.shape
    mean = jnp.mean(x, axis=(0, 2), keepdims=True)
    var = jnp.mean(jnp.square(x - mean), axis=(0, 2), keepdims=True)
    xn = (x - mean) * jax.lax.rsqrt(var + _EPS) * gamma.reshape(1, C, 1) + beta.reshape(1, C, 1)
    h = xn.reshape(B, C * L)
    f = _make_act(act)
    hp = jax.lax.Precision.HIGHEST
    for w, b in fcs:
        h = f(jnp.dot(h, w, precision=hp) + b)
    z = jnp.dot(h, w_out, precision=hp) + b_out
    Y = shapeY
    xc = _softplus(z[:, :Y])
    xs = _softplus(z[:, Y:Y + 2]) + 1.0
    xo = z[:, Y + 2:-7]
    xp1 = jnp.tanh(z[:, -7:-6]) * 1e-4
    xr = z[:, -6:]
    return jnp.concatenate([xc, xs, xo, xp1, xr], axis=-1)


# ------------------------------------ main -------------------------------------------
if __name__ == "__main__":
    key = jax.random.PRNGKey(0)

    # Small shapes consistent with the module: x is (B, shapeX[0], shapeX[1]).
    B = 8
    shapeX = (4, 8)          # 4 channels (BatchNorm1d features), length 8 -> 32 flat features
    shapeY = 4               # output head width = shapeY + 11 = 15
    width, depth = 128, 3    # fc dims: 32 -> 128 -> 64 -> 32 -> 15
    act = "relu"

    C, L = shapeX
    D_in = C * L
    ks = iter(jax.random.split(key, 16))

    def uinit(k, shape, fan_in):
        bound = 1.0 / (fan_in ** 0.5)
        return jax.random.uniform(k, shape, jnp.float32, -bound, bound)

    x = jax.random.normal(next(ks), (B, C, L), jnp.float32)

    # BatchNorm1d affine (randomized slightly to exercise the path; default init is 1/0).
    gamma = 1.0 + 0.1 * jax.random.normal(next(ks), (C,), jnp.float32)
    beta = 0.1 * jax.random.normal(next(ks), (C,), jnp.float32)

    dims = [D_in] + [width // (2 ** i) for i in range(depth)]   # [32, 128, 64, 32]
    fcs = []
    for i in range(depth):
        fan_in = dims[i]
        w = uinit(next(ks), (dims[i], dims[i + 1]), fan_in)     # stored (in, out) = torch W.T
        b = uinit(next(ks), (dims[i + 1],), fan_in)
        fcs.append((w, b))
    fan_in = dims[-1]
    w_out = uinit(next(ks), (dims[-1], shapeY + 11), fan_in)
    b_out = uinit(next(ks), (shapeY + 11,), fan_in)

    params = (gamma, beta, tuple(fcs), (w_out, b_out))

    # Single-tile path (grid=(1,)).
    out = jax.block_until_ready(mlp_forward(x, params, shapeY=shapeY, act=act))
    ref = jax.block_until_ready(_ref_mlp(x, params, shapeY, act=act))
    assert out.shape == (B, shapeY + 11)
    # Tolerance covers the bf16 MXU operands vs. the f32 HIGHEST-precision reference.
    assert jnp.allclose(out, ref, rtol=2e-2, atol=2e-2), "mismatch vs JAX reference (single tile)"

    # Multi-tile grid + batch-padding path (B=20, tm=8 -> grid=(3,), 4 padded rows dropped).
    B2 = 20
    x2 = jax.random.normal(next(ks), (B2, C, L), jnp.float32)
    out2 = jax.block_until_ready(mlp_forward(x2, params, shapeY=shapeY, act=act, tm=8))
    ref2 = jax.block_until_ready(_ref_mlp(x2, params, shapeY, act=act))
    assert out2.shape == (B2, shapeY + 11)
    assert jnp.allclose(out2, ref2, rtol=2e-2, atol=2e-2), "mismatch vs JAX reference (multi tile)"

    print("KERNEL_OK")
</pallas_src>

<mosaic_0001>
module attributes {stable_mosaic.version = 11 : i64} {
  func.func @kernel(%arg0: i32, %arg1: memref<8x32xf32, #tpu.memory_space<vmem>>, %arg2: memref<32x128xbf16, #tpu.memory_space<vmem>>, %arg3: memref<1x128xf32, #tpu.memory_space<vmem>>, %arg4: memref<128x64xbf16, #tpu.memory_space<vmem>>, %arg5: memref<1x64xf32, #tpu.memory_space<vmem>>, %arg6: memref<64x32xbf16, #tpu.memory_space<vmem>>, %arg7: memref<1x32xf32, #tpu.memory_space<vmem>>, %arg8: memref<32x128xbf16, #tpu.memory_space<vmem>>, %arg9: memref<1x128xf32, #tpu.memory_space<vmem>>, %arg10: memref<8x128xf32, #tpu.memory_space<vmem>>) attributes {dimension_semantics = [#tpu.dimension_semantics<parallel>], iteration_bounds = array<i64: 1>, scalar_prefetch = 0 : i64, scratch_operands = 0 : i64, tpu.core_type = #tpu.core_type<tc>, window_params = [{transform_indices = @transform_0, window_bounds = array<i64: 8, 32>}, {pipeline_mode = #tpu.pipeline_mode<synchronous>, transform_indices = @transform_1, window_bounds = array<i64: 32, 128>}, {pipeline_mode = #tpu.pipeline_mode<synchronous>, transform_indices = @transform_2, window_bounds = array<i64: 1, 128>}, {pipeline_mode = #tpu.pipeline_mode<synchronous>, transform_indices = @transform_3, window_bounds = array<i64: 128, 64>}, {pipeline_mode = #tpu.pipeline_mode<synchronous>, transform_indices = @transform_4, window_bounds = array<i64: 1, 64>}, {pipeline_mode = #tpu.pipeline_mode<synchronous>, transform_indices = @transform_5, window_bounds = array<i64: 64, 32>}, {pipeline_mode = #tpu.pipeline_mode<synchronous>, transform_indices = @transform_6, window_bounds = array<i64: 1, 32>}, {pipeline_mode = #tpu.pipeline_mode<synchronous>, transform_indices = @transform_7, window_bounds = array<i64: 32, 128>}, {pipeline_mode = #tpu.pipeline_mode<synchronous>, transform_indices = @transform_8, window_bounds = array<i64: 1, 128>}, {transform_indices = @transform_9, window_bounds = array<i64: 8, 128>}]} {
    %c0 = arith.constant 0 : index
    %c0_0 = arith.constant 0 : index
    %0 = vector.load %arg1[%c0, %c0_0] : memref<8x32xf32, #tpu.memory_space<vmem>>, vector<8x32xf32>
    %c0_1 = arith.constant 0 : index
    %c0_2 = arith.constant 0 : index
    %1 = vector.load %arg2[%c0_1, %c0_2] : memref<32x128xbf16, #tpu.memory_space<vmem>>, vector<32x128xbf16>
    %c0_3 = arith.constant 0 : index
    %c0_4 = arith.constant 0 : index
    %2 = vector.load %arg3[%c0_3, %c0_4] : memref<1x128xf32, #tpu.memory_space<vmem>>, vector<1x128xf32>
    %3 = arith.truncf %0 : vector<8x32xf32> to vector<8x32xbf16>
    %cst = arith.constant dense<0.000000e+00> : vector<8x128xf32>
    %4 = tpu.matmul %3, %1, %cst {dimension_numbers = #tpu.dot_dimension_numbers<[1], [0], [0], [1], [0, 0, 1, 1], [], []>} : vector<8x32xbf16>, vector<32x128xbf16>, vector<8x128xf32> -> vector<8x128xf32>
    %5 = vector.broadcast %2 : vector<1x128xf32> to vector<8x128xf32>
    %6 = arith.addf %4, %5 : vector<8x128xf32>
    %cst_5 = arith.constant 0.000000e+00 : f32
    %7 = vector.broadcast %cst_5 : f32 to vector<8x128xf32>
    %8 = arith.maximumf %6, %7 : vector<8x128xf32>
    %c0_6 = arith.constant 0 : index
    %c0_7 = arith.constant 0 : index
    %9 = vector.load %arg4[%c0_6, %c0_7] : memref<128x64xbf16, #tpu.memory_space<vmem>>, vector<128x64xbf16>
    %c0_8 = arith.constant 0 : index
    %c0_9 = arith.constant 0 : index
    %10 = vector.load %arg5[%c0_8, %c0_9] : memref<1x64xf32, #tpu.memory_space<vmem>>, vector<1x64xf32>
    %11 = arith.truncf %8 : vector<8x128xf32> to vector<8x128xbf16>
    %cst_10 = arith.constant dense<0.000000e+00> : vector<8x64xf32>
    %12 = tpu.matmul %11, %9, %cst_10 {dimension_numbers = #tpu.dot_dimension_numbers<[1], [0], [0], [1], [0, 0, 1, 1], [], []>} : vector<8x128xbf16>, vector<128x64xbf16>, vector<8x64xf32> -> vector<8x64xf32>
    %13 = vector.broadcast %10 : vector<1x64xf32> to vector<8x64xf32>
    %14 = arith.addf %12, %13 : vector<8x64xf32>
    %cst_11 = arith.constant 0.000000e+00 : f32
    %15 = vector.broadcast %cst_11 : f32 to vector<8x64xf32>
    %16 = arith.maximumf %14, %15 : vector<8x64xf32>
    %c0_12 = arith.constant 0 : index
    %c0_13 = arith.constant 0 : index
    %17 = vector.load %arg6[%c0_12, %c0_13] : memref<64x32xbf16, #tpu.memory_space<vmem>>, vector<64x32xbf16>
    %c0_14 = arith.constant 0 : index
    %c0_15 = arith.constant 0 : index
    %18 = vector.load %arg7[%c0_14, %c0_15] : memref<1x32xf32, #tpu.memory_space<vmem>>, vector<1x32xf32>
    %19 = arith.truncf %16 : vector<8x64xf32> to vector<8x64xbf16>
    %cst_16 = arith.constant dense<0.000000e+00> : vector<8x32xf32>
    %20 = tpu.matmul %19, %17, %cst_16 {dimension_numbers = #tpu.dot_dimension_numbers<[1], [0], [0], [1], [0, 0, 1, 1], [], []>} : vector<8x64xbf16>, vector<64x32xbf16>, vector<8x32xf32> -> vector<8x32xf32>
    %21 = vector.broadcast %18 : vector<1x32xf32> to vector<8x32xf32>
    %22 = arith.addf %20, %21 : vector<8x32xf32>
    %cst_17 = arith.constant 0.000000e+00 : f32
    %23 = vector.broadcast %cst_17 : f32 to vector<8x32xf32>
    %24 = arith.maximumf %22, %23 : vector<8x32xf32>
    %c0_18 = arith.constant 0 : index
    %c0_19 = arith.constant 0 : index
    %25 = vector.load %arg8[%c0_18, %c0_19] : memref<32x128xbf16, #tpu.memory_space<vmem>>, vector<32x128xbf16>
    %c0_20 = arith.constant 0 : index
    %c0_21 = arith.constant 0 : index
    %26 = vector.load %arg9[%c0_20, %c0_21] : memref<1x128xf32, #tpu.memory_space<vmem>>, vector<1x128xf32>
    %27 = arith.truncf %24 : vector<8x32xf32> to vector<8x32xbf16>
    %cst_22 = arith.constant dense<0.000000e+00> : vector<8x128xf32>
    %28 = tpu.matmul %27, %25, %cst_22 {dimension_numbers = #tpu.dot_dimension_numbers<[1], [0], [0], [1], [0, 0, 1, 1], [], []>} : vector<8x32xbf16>, vector<32x128xbf16>, vector<8x128xf32> -> vector<8x128xf32>
    %29 = vector.broadcast %26 : vector<1x128xf32> to vector<8x128xf32>
    %30 = arith.addf %28, %29 : vector<8x128xf32>
    %31 = tpu.iota {dimensions = array<i32: 1>} : vector<8x128xi32>
    %cst_23 = arith.constant 2.000000e+01 : f32
    %32 = vector.broadcast %cst_23 : f32 to vector<8x128xf32>
    %33 = arith.cmpf ogt, %30, %32 : vector<8x128xf32>
    %cst_24 = arith.constant 2.000000e+01 : f32
    %34 = vector.broadcast %cst_24 : f32 to vector<8x128xf32>
    %35 = arith.minimumf %30, %34 : vector<8x128xf32>
    %36 = math.exp %35 : vector<8x128xf32>
    %37 = math.log1p %36 : vector<8x128xf32>
    %38 = arith.select %33, %30, %37 : vector<8x128xi1>, vector<8x128xf32>
    %39 = math.tanh %30 : vector<8x128xf32>
    %cst_25 = arith.constant 9.99999974E-5 : f32
    %40 = vector.broadcast %cst_25 : f32 to vector<8x128xf32>
    %41 = arith.mulf %39, %40 : vector<8x128xf32>
    %c4_i32 = arith.constant 4 : i32
    %42 = vector.broadcast %c4_i32 : i32 to vector<8x128xi32>
    %43 = arith.cmpi slt, %31, %42 : vector<8x128xi32>
    %c6_i32 = arith.constant 6 : i32
    %44 = vector.broadcast %c6_i32 : i32 to vector<8x128xi32>
    %45 = arith.cmpi slt, %31, %44 : vector<8x128xi32>
    %cst_26 = arith.constant 1.000000e+00 : f32
    %46 = vector.broadcast %cst_26 : f32 to vector<8x128xf32>
    %47 = arith.addf %38, %46 : vector<8x128xf32>
    %c8_i32 = arith.constant 8 : i32
    %48 = vector.broadcast %c8_i32 : i32 to vector<8x128xi32>
    %49 = arith.cmpi slt, %31, %48 : vector<8x128xi32>
    %c9_i32 = arith.constant 9 : i32
    %50 = vector.broadcast %c9_i32 : i32 to vector<8x128xi32>
    %51 = arith.cmpi slt, %31, %50 : vector<8x128xi32>
    %52 = arith.select %51, %41, %30 : vector<8x128xi1>, vector<8x128xf32>
    %53 = arith.select %49, %30, %52 : vector<8x128xi1>, vector<8x128xf32>
    %54 = arith.select %45, %47, %53 : vector<8x128xi1>, vector<8x128xf32>
    %55 = arith.select %43, %38, %54 : vector<8x128xi1>, vector<8x128xf32>
    %c0_27 = arith.constant 0 : index
    %c0_28 = arith.constant 0 : index
    %56 = vector.load %arg10[%c0_27, %c0_28] : memref<8x128xf32, #tpu.memory_space<vmem>>, vector<8x128xf32>
    tpu.vector_store %arg10[%c0_27, %c0_28], %55 {strides = array<i32>} : memref<8x128xf32, #tpu.memory_space<vmem>>, vector<8x128xf32>,
    return
  }
  func.func @transform_0(%arg0: i32) -> (i32, i32) {
    %c0_i32 = arith.constant 0 : i32
    %c0_i32_0 = arith.constant 0 : i32
    return %arg0, %c0_i32 : i32, i32
  }
  func.func @transform_1(%arg0: i32) -> (i32, i32) {
    %c0_i32 = arith.constant 0 : i32
    %c0_i32_0 = arith.constant 0 : i32
    %c0_i32_1 = arith.constant 0 : i32
    return %c0_i32, %c0_i32_0 : i32, i32
  }
  func.func @transform_2(%arg0: i32) -> (i32, i32) {
    %c0_i32 = arith.constant 0 : i32
    %c0_i32_0 = arith.constant 0 : i32
    %c0_i32_1 = arith.constant 0 : i32
    return %c0_i32, %c0_i32_0 : i32, i32
  }
  func.func @transform_3(%arg0: i32) -> (i32, i32) {
    %c0_i32 = arith.constant 0 : i32
    %c0_i32_0 = arith.constant 0 : i32
    %c0_i32_1 = arith.constant 0 : i32
    return %c0_i32, %c0_i32_0 : i32, i32
  }
  func.func @transform_4(%arg0: i32) -> (i32, i32) {
    %c0_i32 = arith.constant 0 : i32
    %c0_i32_0 = arith.constant 0 : i32
    %c0_i32_1 = arith.constant 0 : i32
    return %c0_i32, %c0_i32_0 : i32, i32
  }
  func.func @transform_5(%arg0: i32) -> (i32, i32) {
    %c0_i32 = arith.constant 0 : i32
    %c0_i32_0 = arith.constant 0 : i32
    %c0_i32_1 = arith.constant 0 : i32
    return %c0_i32, %c0_i32_0 : i32, i32
  }
  func.func @transform_6(%arg0: i32) -> (i32, i32) {
    %c0_i32 = arith.constant 0 : i32
    %c0_i32_0 = arith.constant 0 : i32
    %c0_i32_1 = arith.constant 0 : i32
    return %c0_i32, %c0_i32_0 : i32, i32
  }
  func.func @transform_7(%arg0: i32) -> (i32, i32) {
    %c0_i32 = arith.constant 0 : i32
    %c0_i32_0 = arith.constant 0 : i32
    %c0_i32_1 = arith.constant 0 : i32
    return %c0_i32, %c0_i32_0 : i32, i32
  }
  func.func @transform_8(%arg0: i32) -> (i32, i32) {
    %c0_i32 = arith.constant 0 : i32
    %c0_i32_0 = arith.constant 0 : i32
    %c0_i32_1 = arith.constant 0 : i32
    return %c0_i32, %c0_i32_0 : i32, i32
  }
  func.func @transform_9(%arg0: i32) -> (i32, i32) {
    %c0_i32 = arith.constant 0 : i32
    %c0_i32_0 = arith.constant 0 : i32
    return %arg0, %c0_i32 : i32, i32
  }
}

</mosaic_0001>

<bundles_post_ra>
// kernel: tpu_custom_call.1
= control target key start
LH: loop header
LB: loop body
LE: loop exit
PB: predicated region body
PF: predicated region fallthrough
CT: control target
= control target key end

     0   :  { %s532_s0 = inlined_call_operand.vmem [shape: f32[8,32], index: 0, kind: input, shape index: {}]   ;;  %s533_s1 = inlined_call_operand.vmem [shape: bf16[32,128], index: 1, kind: input, shape index: {}]   ;;  %s534_s2 = inlined_call_operand.vmem [shape: f32[1,128], index: 2, kind: input, shape index: {}]   ;;  %s535_s3 = inlined_call_operand.vmem [shape: bf16[128,64], index: 3, kind: input, shape index: {}]   ;;  %s536_s4 = inlined_call_operand.vmem [shape: f32[1,64], index: 4, kind: input, shape index: {}]   ;;  %s537_s5 = inlined_call_operand.vmem [shape: bf16[64,32], index: 5, kind: input, shape index: {}]   ;;  %s538_s6 = inlined_call_operand.vmem [shape: f32[1,32], index: 6, kind: input, shape index: {}]   ;;  %s539_s7 = inlined_call_operand.vmem [shape: bf16[32,128], index: 7, kind: input, shape index: {}]   ;;  %s540_s8 = inlined_call_operand.vmem [shape: f32[1,128], index: 8, kind: input, shape index: {}]   ;;  %s541_s9 = inlined_call_operand.hbm [shape: f32[8,128], index: 9, kind: output, shape index: {}]  }
   0x1   :  { %v361_v0 = vld [vmem:[%s533_s1 + $0x8] sm:$0xff]  ;;  %v369_v1 = vld [vmem:[%s535_s3 + $0x38] sm:$0xff]  ;;  %v360_v2 = vld [vmem:[%s533_s1] sm:$0xff] }
   0x2   :  { %66 = vmatpush.bf16.msra.mxu0 %v361_v0  ;;  %v34_v3 = vld [vmem:[%s532_s0] sm:$0xff]  ;;  %143 = vmatpush.bf16.msra.mxu1 %v369_v1  ;;  %v368_v4 = vld [vmem:[%s535_s3 + $0x30] sm:$0xff] }
   0x3   :  { %14 = vsyncpa [#allocation3], 0  ;;  %v40_v5 = vpack.c.bf16 %v34_v3, %v34_v3  ;;  %vm56_vm0 = vcmask 261120   ;;  %v367_v6 = vld [vmem:[%s535_s3 + $0x28] sm:$0xff]  ;;  %v366_v7 = vld [vmem:[%s535_s3 + $0x20] sm:$0xff]  ;;  %vm194_vm1 = vcmask 523264   ;;  %v249_v43 = vlaneseq }
   0x4   :  { %v365_v8 = vld [vmem:[%s535_s3 + $0x18] sm:$0xff]  ;;  %v364_v9 = vld [vmem:[%s535_s3 + $0x10] sm:$0xff]  ;;  %v363_v10 = vld [vmem:[%s535_s3 + $0x8] sm:$0xff]  ;;  %s284_s23 = sshll.u32 %s541_s9, 4  ;;  %s285_s23 = int_to_ptr.hbm [resolvable:$true] %s284_s23 }
   0x5   :  { %v362_v11 = vld [vmem:[%s535_s3] sm:$0xff]  ;;  %v373_v12 = vld [vmem:[%s537_s5 + $0x18] sm:$0xff]  ;;  %v372_v13 = vld [vmem:[%s537_s5 + $0x10] sm:$0xff]  ;;  %v250_v47 = vand.u32 127, %v249_v43 }
   0x6   :  { %67 = vmatpush.bf16.msra.mxu0 %v360_v2  ;;  %144 = vmatpush.bf16.msra.mxu1 %v368_v4  ;;  %v377_v14 = vld [vmem:[%s534_s2] ss:$0 sm:$0xff]  ;;  %v371_v20 = vld [vmem:[%s537_s5 + $0x8] sm:$0xff] }
   0x7   :  { %202 = vmatpush.bf16.msra.mxu2 %v373_v12  ;;  %v370_v21 = vld [vmem:[%s537_s5] sm:$0xff]  ;;  %v375_v28 = vld [vmem:[%s539_s7 + $0x8] sm:$0xff]  ;;  %vm271_vm2 = vcmp.lt.s32.totalorder %v250_v47, 9  ;;  %vm270_vm5 = vcmp.lt.s32.totalorder %v250_v47, 8  ;;  %vm268_vm6 = vcmp.lt.s32.totalorder %v250_v47, 6  ;;  %vm267_vm7 = vcmp.lt.s32.totalorder %v250_v47, 4 }
   0x8   :  { %v378_v22 = vld [vmem:[%s536_s4] ss:$0 sm:$0xff]  ;;  %242 = vmatpush.bf16.msra.mxu3 %v375_v28 }
   0x9   :  { %301 = vmatmul.msk.bf16.vlgmr.msra.gmra.mxu0 %vm56_vm0, %v40_v5  ;;  %v374_v29 = vld [vmem:[%s539_s7] sm:$0xff] }
   0xa   :  { %145 = vmatpush.bf16.msra.mxu1 %v367_v6  ;;  %v379_v30 = vld [vmem:[%s538_s6] ss:$0 sm:$0xff]  ;;  %s413_s6 = smov [#allocation2]  }
   0xb   :  { %203 = vmatpush.bf16.msra.mxu2 %v372_v13  ;;  %v380_v36 = vld [vmem:[%s540_s8] ss:$0 sm:$0xff]  ;;  %s282_s7 = sshll.u32 %s413_s6, 4  ;;  %s283_s7 = int_to_ptr.vmem [resolvable:$true] %s282_s7 }
   0xc   :  { %243 = vmatpush.bf16.msra.mxu3 %v374_v29 }
   0xe   :  { %146 = vmatpush.bf16.msra.mxu1 %v366_v7 }
   0xf   :  { %204 = vmatpush.bf16.msra.mxu2 %v371_v20 }
  0x12   :  { %147 = vmatpush.bf16.msra.mxu1 %v365_v8 }
  0x13   :  { %205 = vmatpush.bf16.msra.mxu2 %v370_v21 }
  0x16   :  { %148 = vmatpush.bf16.msra.mxu1 %v364_v9 }
  0x1a   :  { %149 = vmatpush.bf16.msra.mxu1 %v363_v10 }
  0x1e   :  { %150 = vmatpush.bf16.msra.mxu1 %v362_v11 }
  0x86   :  { %v69_v15 = vpop.f32.mrf.mxu0 }
  0x87   :  { %v70_v16 = vadd.f32 %v377_v14, %v69_v15 }
  0x89   :  { %v73_v17 = vmax.f32 %v70_v16, 0.0 }
  0x8b   :  { %v91_v18 = vpack.c.bf16 %v73_v17, %v73_v17 }
  0x8d   :  { %151 = vmatmul.bf16.vlgmr.msra.gmra.mxu1 %v91_v18 }
  0x8e   :  { %v71_v19 = vpop.f32.mrf.mxu0 }
 0x10a   :  { %v152_v23 = vpop.f32.mrf.mxu1 }
 0x10b   :  { %v153_v24 = vadd.f32 %v378_v22, %v152_v23 }
 0x10d   :  { %v156_v25 = vmax.f32 %v153_v24, 0.0 }
 0x10f   :  { %v166_v26 = vpack.c.bf16 %v156_v25, %v156_v25 }
 0x111   :  { %350 = vmatmul.msk.bf16.vlgmr.msra.gmra.mxu2 %vm194_vm1, %v166_v26 }
 0x112   :  { %v154_v27 = vpop.f32.mrf.mxu1 }
 0x194   :  { %v207_v31 = vpop.f32.mrf.mxu2 }
 0x195   :  { %v208_v32 = vadd.f32 %v379_v30, %v207_v31 }
 0x197   :  { %v211_v33 = vmax.f32 %v208_v32, 0.0 }
 0x199   :  { %v217_v34 = vpack.c.bf16 %v211_v33, %v211_v33 }
 0x19b   :  { %359 = vmatmul.msk.bf16.vlgmr.msra.gmra.mxu3 %vm56_vm0, %v217_v34 }
 0x19c   :  { %v209_v35 = vpop.f32.mrf.mxu2 }
 0x21e   :  { %v245_v37 = vpop.f32.mrf.mxu3 }
 0x21f   :  { %v246_v38 = vadd.f32 %v380_v36, %v245_v37 }
 0x221   :  { %v252_v39 = vmin.f32 %v246_v38, 20.0  ;;  %vm251_vm4 = vcmp.gt.f32.partialorder %v246_v38, 20.0 }
 0x223   :  { %v253_v40 = vmul.f32 1.442695, %v252_v39 }
 0x225   :  { %381 = vpow2.f32 %v253_v40 }
 0x226   :  { %v247_v41 = vpop.f32.mrf.mxu3  ;;  %383 = vtanh.f32 %v246_v38 }
 0x22b   :  { %v382_v42 = vpop.eup %381 }
 0x22c   :  { %v255_v44 = vadd.f32 1.0, %v382_v42  ;;  %v258_v45 = vmul.f32 -0.5, %v382_v42  ;;  %v384_v46 = vpop.eup %383  ;;  %v261_v49 = vand.u32 2147483647, %v382_v42 }
 0x22d   :  { %v266_v50 = vmul.f32 0.0001, %v384_v46 }
 0x22e   :  { %385 = vlog2.f32 %v255_v44  ;;  %v259_v48 = vadd.f32 1.0, %v258_v45  ;;  %vm262_vm3 = vcmp.lt.f32.partialorder %v261_v49, 0.0004427343 }
 0x22f   :  { %v272_v55 = vsel %vm271_vm2, %v266_v50, %v246_v38 }
 0x230   :  { %v260_v53 = vmul.f32 %v382_v42, %v259_v48  ;;  %v273_v58 = vsel %vm270_vm5, %v246_v38, %v272_v55 }
 0x234   :  { %v386_v51 = vpop.eup %385 }
 0x235   :  { %v257_v52 = vmul.f32 0.6931472, %v386_v51 }
 0x237   :  { %v263_v54 = vsel %vm262_vm3, %v260_v53, %v257_v52 }
 0x238   :  { %v264_v56 = vsel %vm251_vm4, %v246_v38, %v263_v54 }
 0x239   :  { %v269_v57 = vadd.f32 1.0, %v264_v56 }
 0x23b   :  { %v274_v59 = vsel %vm268_vm6, %v269_v57, %v273_v58 }
 0x23c   :  { %v275_v60 = vsel %vm267_vm7, %v264_v56, %v274_v59 }
 0x23d   :  { %276 = vst [vmem:[#allocation2] sm:$0xff] %v275_v60 }
 0x23e   :  { %287 = dma.vmem_to_hbm [thread:$0]  %s283_s7, 128, %s285_s23, [#allocation3]  }
 0x23f   :  { %411 = dma.done.wait [#allocation3], 128  }
 0x240   :  { %412 = vsyncadd [#allocation3], 4294967168 }
 0x241   :  { %292 = vsyncpa [#allocation3], 1 }

</bundles_post_ra>
